<compile_context>
chip_gen: v7x
topology: tpu7x:2x2x1
jax: 0.10.0
libtpu: 0.0.40
codegen_flags: <defaults>
</compile_context>

<pallas_src>
import functools

import jax
import jax.numpy as jnp
import numpy as np
from jax.experimental import pallas as pl
from jax.experimental.pallas import tpu as pltpu

_LN_EPS = 1e-5  # torch.nn.LayerNorm default


def _layernorm(x, gamma, beta, eps=_LN_EPS):
    mu = jnp.mean(x, axis=-1, keepdims=True)
    xm = x - mu                                     # computed once, reused below
    var = jnp.mean(xm * xm, axis=-1, keepdims=True)
    return xm * jax.lax.rsqrt(var + eps) * gamma + beta


def critic_kernel(state_ref, action_ref, w1_ref, w2_ref, wa_ref, pvec_ref,
                  out_ref, *, fc1_dims, fc2_dims):
    # Packed (1, F) parameter rows (single operand -> single DMA):
    #   0:b1  1:g1  2:be1  3:b2  4:g2  5:be2  6:ba  7:wq(row)  8:bq(scalar @ [8,0])
    b1 = pvec_ref[0:1, :fc1_dims]
    g1 = pvec_ref[1:2, :fc1_dims]
    be1 = pvec_ref[2:3, :fc1_dims]
    b2 = pvec_ref[3:4, :fc2_dims]
    g2 = pvec_ref[4:5, :fc2_dims]
    be2 = pvec_ref[5:6, :fc2_dims]
    ba = pvec_ref[6:7, :fc2_dims]
    wq = pvec_ref[7:8, :fc2_dims]
    bq = pvec_ref[8:9, 0:1]

    x = state_ref[...].astype(jnp.bfloat16)
    a_in = action_ref[...].astype(jnp.bfloat16)

    # fc1 -> LayerNorm -> relu   (bf16 MXU matmul, f32 accumulate, f32 LN math)
    h1 = jnp.dot(x, w1_ref[...], preferred_element_type=jnp.float32) + b1
    h1 = _layernorm(h1, g1, be1)
    h1 = jnp.maximum(h1, 0.0)

    # fc2 -> LayerNorm   (no relu, as in the original forward)
    h2 = jnp.dot(h1.astype(jnp.bfloat16), w2_ref[...],
                 preferred_element_type=jnp.float32) + b2
    h2 = _layernorm(h2, g2, be2)

    # action branch: linear -> relu
    av = jnp.dot(a_in, wa_ref[...], preferred_element_type=jnp.float32) + ba
    av = jnp.maximum(av, 0.0)

    # fuse, relu; q head as VPU multiply + lane reduce instead of an N=1 matmul
    sa = jnp.maximum(h2 + av, 0.0)
    q = jnp.sum(sa * wq, axis=-1, keepdims=True) + bq
    out_ref[...] = q.astype(out_ref.dtype)        # single contiguous (TILE_B, 1) store


def critic_forward(state, action, packed, *, tile_b=None):
    """Batched Pallas call: grid over the batch, weights resident in VMEM."""
    B, input_dim = state.shape
    n_actions = action.shape[1]
    w1, w2, wa, pvec = packed["w1"], packed["w2"], packed["wa"], packed["pvec"]
    fc1_dims = w1.shape[1]
    fc2_dims = w2.shape[1]

    if tile_b is None:
        tile_b = min(256, B)                      # f32: multiple of 8 sublanes
    assert B % tile_b == 0, "pad the batch to a multiple of tile_b"
    assert tile_b == B or tile_b % 8 == 0

    kernel = functools.partial(critic_kernel, fc1_dims=fc1_dims, fc2_dims=fc2_dims)

    # Advisory scheduling hint for XLA (zero risk).
    flops = 2 * B * (input_dim * fc1_dims + fc1_dims * fc2_dims
                     + n_actions * fc2_dims + fc2_dims)
    bytes_accessed = (state.size * state.dtype.itemsize
                      + action.size * action.dtype.itemsize
                      + w1.size * w1.dtype.itemsize
                      + w2.size * w2.dtype.itemsize
                      + wa.size * wa.dtype.itemsize
                      + pvec.size * pvec.dtype.itemsize
                      + B * 4)
    cost = pl.CostEstimate(flops=flops, transcendentals=2 * B,
                           bytes_accessed=bytes_accessed)

    return pl.pallas_call(
        kernel,
        out_shape=jax.ShapeDtypeStruct((B, 1), jnp.float32),
        grid_spec=pltpu.PrefetchScalarGridSpec(
            num_scalar_prefetch=0,
            grid=(B // tile_b,),
            in_specs=[
                pl.BlockSpec((tile_b, input_dim), lambda i: (i, 0)),
                pl.BlockSpec((tile_b, n_actions), lambda i: (i, 0)),
                pl.BlockSpec(w1.shape, lambda i: (0, 0)),    # weights stay resident
                pl.BlockSpec(w2.shape, lambda i: (0, 0)),
                pl.BlockSpec(wa.shape, lambda i: (0, 0)),
                pl.BlockSpec(pvec.shape, lambda i: (0, 0)),  # packed small params
            ],
            out_specs=pl.BlockSpec((tile_b, 1), lambda i: (i, 0)),
        ),
        compiler_params=pltpu.CompilerParams(
            dimension_semantics=("parallel",)),              # v7x: both TCs
        cost_estimate=cost,
    )(state, action, w1, w2, wa, pvec)


def init_params(key, input_dim, fc1_dims, fc2_dims, n_actions):
    """f32 master params mirroring the PyTorch module's init ranges.

    (Reproduces the module's quirk: f1 = 1/sqrt(weight.size(0)) = 1/sqrt(out_features).)
    Weights stored as (in_features, out_features).
    """
    ks = jax.random.split(key, 8)
    f1 = 1.0 / np.sqrt(fc1_dims)
    f2 = 1.0 / np.sqrt(fc2_dims)
    f3 = 0.003
    fa = 1.0 / np.sqrt(n_actions)   # PyTorch default init bound for action_value

    def u(k, shape, bound):
        return jax.random.uniform(k, shape, jnp.float32, -bound, bound)

    return {
        "w1": u(ks[0], (input_dim, fc1_dims), f1),
        "b1": u(ks[1], (1, fc1_dims), f1),
        "g1": jnp.ones((1, fc1_dims), jnp.float32),
        "be1": jnp.zeros((1, fc1_dims), jnp.float32),
        "w2": u(ks[2], (fc1_dims, fc2_dims), f2),
        "b2": u(ks[3], (1, fc2_dims), f2),
        "g2": jnp.ones((1, fc2_dims), jnp.float32),
        "be2": jnp.zeros((1, fc2_dims), jnp.float32),
        "wa": u(ks[4], (n_actions, fc2_dims), fa),
        "ba": u(ks[5], (1, fc2_dims), fa),
        "wq": u(ks[6], (fc2_dims, 1), f3),
        "bq": u(ks[7], (1, 1), f3),
    }


def pack_params(p):
    """Kernel-side layout: bf16 matmul weights + one packed (9, F) f32 vector slab."""
    fc1 = p["w1"].shape[1]
    fc2 = p["w2"].shape[1]
    width = max(fc1, fc2)

    def pad_row(row):
        out = jnp.zeros((1, width), jnp.float32)
        return out.at[:, :row.shape[1]].set(row.astype(jnp.float32))

    pvec = jnp.concatenate([
        pad_row(p["b1"]), pad_row(p["g1"]), pad_row(p["be1"]),
        pad_row(p["b2"]), pad_row(p["g2"]), pad_row(p["be2"]),
        pad_row(p["ba"]), pad_row(p["wq"].T), pad_row(p["bq"]),
    ], axis=0)                                   # (9, width)

    return {
        "w1": p["w1"].astype(jnp.bfloat16),
        "w2": p["w2"].astype(jnp.bfloat16),
        "wa": p["wa"].astype(jnp.bfloat16),
        "pvec": pvec,
    }


def reference_forward_matched(state, action, p):
    """Pure-JAX reference with the kernel's mixed precision (bf16 matmuls, f32 LN)."""
    bf, f32 = jnp.bfloat16, jnp.float32
    h1 = jnp.dot(state.astype(bf), p["w1"].astype(bf),
                 preferred_element_type=f32) + p["b1"]
    h1 = _layernorm(h1, p["g1"], p["be1"])
    h1 = jnp.maximum(h1, 0.0)
    h2 = jnp.dot(h1.astype(bf), p["w2"].astype(bf),
                 preferred_element_type=f32) + p["b2"]
    h2 = _layernorm(h2, p["g2"], p["be2"])
    av = jnp.maximum(jnp.dot(action.astype(bf), p["wa"].astype(bf),
                             preferred_element_type=f32) + p["ba"], 0.0)
    sa = jnp.maximum(h2 + av, 0.0)
    return jnp.sum(sa * p["wq"].T, axis=-1, keepdims=True) + p["bq"]


def reference_forward_f32(state, action, p):
    """Full-f32 reference matching the PyTorch module's semantics."""
    h1 = state @ p["w1"] + p["b1"]
    h1 = _layernorm(h1, p["g1"], p["be1"])
    h1 = jnp.maximum(h1, 0.0)
    h2 = h1 @ p["w2"] + p["b2"]
    h2 = _layernorm(h2, p["g2"], p["be2"])
    av = jnp.maximum(action @ p["wa"] + p["ba"], 0.0)
    sa = jnp.maximum(h2 + av, 0.0)
    return sa @ p["wq"] + p["bq"]


if __name__ == "__main__":
    # Small shapes consistent with the module's Linear stack; B/TILE_B chosen so
    # the batch grid (4 steps) is actually exercised.
    B, INPUT_DIM, FC1, FC2, N_ACTIONS = 64, 16, 32, 32, 4
    TILE_B = 16

    key = jax.random.PRNGKey(0)
    k_state, k_action, k_params = jax.random.split(key, 3)

    state = jax.random.normal(k_state, (B, INPUT_DIM), jnp.float32)
    action = jax.random.normal(k_action, (B, N_ACTIONS), jnp.float32)
    params = init_params(k_params, INPUT_DIM, FC1, FC2, N_ACTIONS)
    packed = pack_params(params)

    q = critic_forward(state, action, packed, tile_b=TILE_B)
    q = jax.block_until_ready(q)
    assert q.shape == (B, 1)

    # Tight check vs a reference with identical mixed-precision math.
    q_matched = reference_forward_matched(state, action, params)
    np.testing.assert_allclose(np.asarray(q), np.asarray(q_matched),
                               rtol=1e-3, atol=1e-4)

    # Loose check vs the full-f32 PyTorch-semantics reference (bf16 weight error only).
    q_f32 = reference_forward_f32(state, action, params)
    np.testing.assert_allclose(np.asarray(q), np.asarray(q_f32),
                               rtol=5e-2, atol=5e-2)

    print("KERNEL_OK")
</pallas_src>

<mosaic_0001>
module attributes {stable_mosaic.version = 11 : i64} {
  func.func @critic_kernel(%arg0: i32, %arg1: memref<16x16xf32, #tpu.memory_space<vmem>>, %arg2: memref<16x4xf32, #tpu.memory_space<vmem>>, %arg3: memref<16x32xbf16, #tpu.memory_space<vmem>>, %arg4: memref<32x32xbf16, #tpu.memory_space<vmem>>, %arg5: memref<4x32xbf16, #tpu.memory_space<vmem>>, %arg6: memref<9x32xf32, #tpu.memory_space<vmem>>, %arg7: memref<16x1xf32, #tpu.memory_space<vmem>>) attributes {dimension_semantics = [#tpu.dimension_semantics<parallel>], iteration_bounds = array<i64: 4>, scalar_prefetch = 0 : i64, scratch_operands = 0 : i64, tpu.core_type = #tpu.core_type<tc>, window_params = [{transform_indices = @transform_0, window_bounds = array<i64: 16, 16>}, {transform_indices = @transform_1, window_bounds = array<i64: 16, 4>}, {pipeline_mode = #tpu.pipeline_mode<synchronous>, transform_indices = @transform_2, window_bounds = array<i64: 16, 32>}, {pipeline_mode = #tpu.pipeline_mode<synchronous>, transform_indices = @transform_3, window_bounds = array<i64: 32, 32>}, {pipeline_mode = #tpu.pipeline_mode<synchronous>, transform_indices = @transform_4, window_bounds = array<i64: 4, 32>}, {pipeline_mode = #tpu.pipeline_mode<synchronous>, transform_indices = @transform_5, window_bounds = array<i64: 9, 32>}, {transform_indices = @transform_6, window_bounds = array<i64: 16, 1>}]} {
    %c0 = arith.constant 0 : index
    %c0_0 = arith.constant 0 : index
    %0 = vector.load %arg6[%c0, %c0_0] : memref<9x32xf32, #tpu.memory_space<vmem>>, vector<1x32xf32>
    %c1 = arith.constant 1 : index
    %c0_1 = arith.constant 0 : index
    %1 = vector.load %arg6[%c1, %c0_1] : memref<9x32xf32, #tpu.memory_space<vmem>>, vector<1x32xf32>
    %c2 = arith.constant 2 : index
    %c0_2 = arith.constant 0 : index
    %2 = vector.load %arg6[%c2, %c0_2] : memref<9x32xf32, #tpu.memory_space<vmem>>, vector<1x32xf32>
    %c3 = arith.constant 3 : index
    %c0_3 = arith.constant 0 : index
    %3 = vector.load %arg6[%c3, %c0_3] : memref<9x32xf32, #tpu.memory_space<vmem>>, vector<1x32xf32>
    %c4 = arith.constant 4 : index
    %c0_4 = arith.constant 0 : index
    %4 = vector.load %arg6[%c4, %c0_4] : memref<9x32xf32, #tpu.memory_space<vmem>>, vector<1x32xf32>
    %c5 = arith.constant 5 : index
    %c0_5 = arith.constant 0 : index
    %5 = vector.load %arg6[%c5, %c0_5] : memref<9x32xf32, #tpu.memory_space<vmem>>, vector<1x32xf32>
    %c6 = arith.constant 6 : index
    %c0_6 = arith.constant 0 : index
    %6 = vector.load %arg6[%c6, %c0_6] : memref<9x32xf32, #tpu.memory_space<vmem>>, vector<1x32xf32>
    %c7 = arith.constant 7 : index
    %c0_7 = arith.constant 0 : index
    %7 = vector.load %arg6[%c7, %c0_7] : memref<9x32xf32, #tpu.memory_space<vmem>>, vector<1x32xf32>
    %c8 = arith.constant 8 : index
    %c0_8 = arith.constant 0 : index
    %8 = vector.load %arg6[%c8, %c0_8] : memref<9x32xf32, #tpu.memory_space<vmem>>, vector<1x1xf32>
    %c0_9 = arith.constant 0 : index
    %c0_10 = arith.constant 0 : index
    %9 = vector.load %arg1[%c0_9, %c0_10] : memref<16x16xf32, #tpu.memory_space<vmem>>, vector<16x16xf32>
    %10 = arith.truncf %9 : vector<16x16xf32> to vector<16x16xbf16>
    %c0_11 = arith.constant 0 : index
    %c0_12 = arith.constant 0 : index
    %11 = vector.load %arg2[%c0_11, %c0_12] : memref<16x4xf32, #tpu.memory_space<vmem>>, vector<16x4xf32>
    %12 = arith.truncf %11 : vector<16x4xf32> to vector<16x4xbf16>
    %c0_13 = arith.constant 0 : index
    %c0_14 = arith.constant 0 : index
    %13 = vector.load %arg3[%c0_13, %c0_14] : memref<16x32xbf16, #tpu.memory_space<vmem>>, vector<16x32xbf16>
    %cst = arith.constant dense<0.000000e+00> : vector<16x32xf32>
    %14 = tpu.matmul %10, %13, %cst {dimension_numbers = #tpu.dot_dimension_numbers<[1], [0], [0], [1], [0, 0, 1, 1], [], []>} : vector<16x16xbf16>, vector<16x32xbf16>, vector<16x32xf32> -> vector<16x32xf32>
    %15 = vector.broadcast %0 : vector<1x32xf32> to vector<16x32xf32>
    %16 = arith.addf %14, %15 : vector<16x32xf32>
    %cst_15 = arith.constant dense<0.000000e+00> : vector<16xf32>
    %17 = vector.multi_reduction <add>, %16, %cst_15 [1] : vector<16x32xf32> to vector<16xf32>
    %18 = vector.shape_cast %17 : vector<16xf32> to vector<16x1xf32>
    %cst_16 = arith.constant 3.200000e+01 : f32
    %19 = vector.broadcast %cst_16 : f32 to vector<16x1xf32>
    %20 = arith.divf %18, %19 : vector<16x1xf32>
    %21 = vector.broadcast %20 : vector<16x1xf32> to vector<16x32xf32>
    %22 = arith.subf %16, %21 : vector<16x32xf32>
    %23 = arith.mulf %22, %22 : vector<16x32xf32>
    %cst_17 = arith.constant dense<0.000000e+00> : vector<16xf32>
    %24 = vector.multi_reduction <add>, %23, %cst_17 [1] : vector<16x32xf32> to vector<16xf32>
    %25 = vector.shape_cast %24 : vector<16xf32> to vector<16x1xf32>
    %cst_18 = arith.constant 3.200000e+01 : f32
    %26 = vector.broadcast %cst_18 : f32 to vector<16x1xf32>
    %27 = arith.divf %25, %26 : vector<16x1xf32>
    %cst_19 = arith.constant 9.99999974E-6 : f32
    %28 = vector.broadcast %cst_19 : f32 to vector<16x1xf32>
    %29 = arith.addf %27, %28 : vector<16x1xf32>
    %30 = math.rsqrt %29 : vector<16x1xf32>
    %31 = vector.broadcast %30 : vector<16x1xf32> to vector<16x32xf32>
    %32 = arith.mulf %22, %31 : vector<16x32xf32>
    %33 = vector.broadcast %1 : vector<1x32xf32> to vector<16x32xf32>
    %34 = arith.mulf %32, %33 : vector<16x32xf32>
    %35 = vector.broadcast %2 : vector<1x32xf32> to vector<16x32xf32>
    %36 = arith.addf %34, %35 : vector<16x32xf32>
    %cst_20 = arith.constant 0.000000e+00 : f32
    %37 = vector.broadcast %cst_20 : f32 to vector<16x32xf32>
    %38 = arith.maximumf %36, %37 : vector<16x32xf32>
    %39 = arith.truncf %38 : vector<16x32xf32> to vector<16x32xbf16>
    %c0_21 = arith.constant 0 : index
    %c0_22 = arith.constant 0 : index
    %40 = vector.load %arg4[%c0_21, %c0_22] : memref<32x32xbf16, #tpu.memory_space<vmem>>, vector<32x32xbf16>
    %cst_23 = arith.constant dense<0.000000e+00> : vector<16x32xf32>
    %41 = tpu.matmul %39, %40, %cst_23 {dimension_numbers = #tpu.dot_dimension_numbers<[1], [0], [0], [1], [0, 0, 1, 1], [], []>} : vector<16x32xbf16>, vector<32x32xbf16>, vector<16x32xf32> -> vector<16x32xf32>
    %42 = vector.broadcast %3 : vector<1x32xf32> to vector<16x32xf32>
    %43 = arith.addf %41, %42 : vector<16x32xf32>
    %cst_24 = arith.constant dense<0.000000e+00> : vector<16xf32>
    %44 = vector.multi_reduction <add>, %43, %cst_24 [1] : vector<16x32xf32> to vector<16xf32>
    %45 = vector.shape_cast %44 : vector<16xf32> to vector<16x1xf32>
    %cst_25 = arith.constant 3.200000e+01 : f32
    %46 = vector.broadcast %cst_25 : f32 to vector<16x1xf32>
    %47 = arith.divf %45, %46 : vector<16x1xf32>
    %48 = vector.broadcast %47 : vector<16x1xf32> to vector<16x32xf32>
    %49 = arith.subf %43, %48 : vector<16x32xf32>
    %50 = arith.mulf %49, %49 : vector<16x32xf32>
    %cst_26 = arith.constant dense<0.000000e+00> : vector<16xf32>
    %51 = vector.multi_reduction <add>, %50, %cst_26 [1] : vector<16x32xf32> to vector<16xf32>
    %52 = vector.shape_cast %51 : vector<16xf32> to vector<16x1xf32>
    %cst_27 = arith.constant 3.200000e+01 : f32
    %53 = vector.broadcast %cst_27 : f32 to vector<16x1xf32>
    %54 = arith.divf %52, %53 : vector<16x1xf32>
    %cst_28 = arith.constant 9.99999974E-6 : f32
    %55 = vector.broadcast %cst_28 : f32 to vector<16x1xf32>
    %56 = arith.addf %54, %55 : vector<16x1xf32>
    %57 = math.rsqrt %56 : vector<16x1xf32>
    %58 = vector.broadcast %57 : vector<16x1xf32> to vector<16x32xf32>
    %59 = arith.mulf %49, %58 : vector<16x32xf32>
    %60 = vector.broadcast %4 : vector<1x32xf32> to vector<16x32xf32>
    %61 = arith.mulf %59, %60 : vector<16x32xf32>
    %62 = vector.broadcast %5 : vector<1x32xf32> to vector<16x32xf32>
    %63 = arith.addf %61, %62 : vector<16x32xf32>
    %c0_29 = arith.constant 0 : index
    %c0_30 = arith.constant 0 : index
    %64 = vector.load %arg5[%c0_29, %c0_30] : memref<4x32xbf16, #tpu.memory_space<vmem>>, vector<4x32xbf16>
    %cst_31 = arith.constant dense<0.000000e+00> : vector<16x32xf32>
    %65 = tpu.matmul %12, %64, %cst_31 {dimension_numbers = #tpu.dot_dimension_numbers<[1], [0], [0], [1], [0, 0, 1, 1], [], []>} : vector<16x4xbf16>, vector<4x32xbf16>, vector<16x32xf32> -> vector<16x32xf32>
    %66 = vector.broadcast %6 : vector<1x32xf32> to vector<16x32xf32>
    %67 = arith.addf %65, %66 : vector<16x32xf32>
    %cst_32 = arith.constant 0.000000e+00 : f32
    %68 = vector.broadcast %cst_32 : f32 to vector<16x32xf32>
    %69 = arith.maximumf %67, %68 : vector<16x32xf32>
    %70 = arith.addf %63, %69 : vector<16x32xf32>
    %cst_33 = arith.constant 0.000000e+00 : f32
    %71 = vector.broadcast %cst_33 : f32 to vector<16x32xf32>
    %72 = arith.maximumf %70, %71 : vector<16x32xf32>
    %73 = vector.broadcast %7 : vector<1x32xf32> to vector<16x32xf32>
    %74 = arith.mulf %72, %73 : vector<16x32xf32>
    %cst_34 = arith.constant dense<0.000000e+00> : vector<16xf32>
    %75 = vector.multi_reduction <add>, %74, %cst_34 [1] : vector<16x32xf32> to vector<16xf32>
    %76 = vector.shape_cast %75 : vector<16xf32> to vector<16x1xf32>
    %77 = vector.broadcast %8 : vector<1x1xf32> to vector<16x1xf32>
    %78 = arith.addf %76, %77 : vector<16x1xf32>
    %c0_35 = arith.constant 0 : index
    %c0_36 = arith.constant 0 : index
    %79 = vector.load %arg7[%c0_35, %c0_36] : memref<16x1xf32, #tpu.memory_space<vmem>>, vector<16x1xf32>
    tpu.vector_store %arg7[%c0_35, %c0_36], %78 {strides = array<i32>} : memref<16x1xf32, #tpu.memory_space<vmem>>, vector<16x1xf32>,
    return
  }
  func.func @transform_0(%arg0: i32) -> (i32, i32) {
    %c0_i32 = arith.constant 0 : i32
    %c0_i32_0 = arith.constant 0 : i32
    return %arg0, %c0_i32 : i32, i32
  }
  func.func @transform_1(%arg0: i32) -> (i32, i32) {
    %c0_i32 = arith.constant 0 : i32
    %c0_i32_0 = arith.constant 0 : i32
    return %arg0, %c0_i32 : i32, i32
  }
  func.func @transform_2(%arg0: i32) -> (i32, i32) {
    %c0_i32 = arith.constant 0 : i32
    %c0_i32_0 = arith.constant 0 : i32
    %c0_i32_1 = arith.constant 0 : i32
    return %c0_i32, %c0_i32_0 : i32, i32
  }
  func.func @transform_3(%arg0: i32) -> (i32, i32) {
    %c0_i32 = arith.constant 0 : i32
    %c0_i32_0 = arith.constant 0 : i32
    %c0_i32_1 = arith.constant 0 : i32
    return %c0_i32, %c0_i32_0 : i32, i32
  }
  func.func @transform_4(%arg0: i32) -> (i32, i32) {
    %c0_i32 = arith.constant 0 : i32
    %c0_i32_0 = arith.constant 0 : i32
    %c0_i32_1 = arith.constant 0 : i32
    return %c0_i32, %c0_i32_0 : i32, i32
  }
  func.func @transform_5(%arg0: i32) -> (i32, i32) {
    %c0_i32 = arith.constant 0 : i32
    %c0_i32_0 = arith.constant 0 : i32
    %c0_i32_1 = arith.constant 0 : i32
    return %c0_i32, %c0_i32_0 : i32, i32
  }
  func.func @transform_6(%arg0: i32) -> (i32, i32) {
    %c0_i32 = arith.constant 0 : i32
    %c0_i32_0 = arith.constant 0 : i32
    return %arg0, %c0_i32 : i32, i32
  }
}

</mosaic_0001>

<bundles_post_ra>
// kernel: tpu_custom_call.1
= control target key start
LH: loop header
LB: loop body
LE: loop exit
PB: predicated region body
PF: predicated region fallthrough
CT: control target
= control target key end

     0   :  { %s765_s21 = smov 0   ;;  %s840_s0 = inlined_call_operand.vmem [shape: f32[64,16], index: 0, kind: input, shape index: {}]   ;;  %s841_s1 = inlined_call_operand.vmem [shape: f32[64,4], index: 1, kind: input, shape index: {}]   ;;  %s842_s2 = inlined_call_operand.vmem [shape: bf16[16,32], index: 2, kind: input, shape index: {}]   ;;  %s843_s3 = inlined_call_operand.vmem [shape: bf16[32,32], index: 3, kind: input, shape index: {}]   ;;  %s844_s4 = inlined_call_operand.vmem [shape: bf16[4,32], index: 4, kind: input, shape index: {}]   ;;  %s845_s5 = inlined_call_operand.vmem [shape: f32[9,32], index: 5, kind: input, shape index: {}]   ;;  %s846_s6 = inlined_call_operand.vmem [shape: f32[64,1], index: 6, kind: output, shape index: {}]  }
   0x1 LB: > { %s644_s22 = sadd.s32 4294967295, %s726_s21   ;;  %p648_p0 = scmp.ge.s32.totalorder %s726_s21, 1  ;;  %s726_s21 = sphi %s765_s21, %s16_s21  }
   0x2   : > { %p224_p1 = scmp.lt.s32.totalorder %s726_s21, 5 }
   0x4   : > { %p225_p2 = pnand %p648_p0, %p224_p1 }
   0x5   : > { %v709_v0 = vld [vmem:[%s842_s2] sm:$0xff] (!%p225_p2)   ;;  %v728_v1 = vmov (!%p225_p2), 0.0   ;;  %s649_s25 = sshll.u32 (!%p225_p2), %s644_s22, 1  ;;  %vm729_vm0 = vmmov (!%p225_p2), 0   ;;  %vm305_vm1 = vcmask (!%p225_p2), 130048   ;;  %vm350_vm2 = vcmask (!%p225_p2), 261120  }
   0x6   : > { %228 = sbr.rel (%p225_p2) target bundleno = 1235 (0x4d3), region = 44  ;;  %679 = vmatprep.subr.bf16.mxu0 (!%p225_p2), %v728_v1  ;;  %685 = vmatprep.subr.bf16.mxu1 (!%p225_p2), %v728_v1  ;;  %p260_p3 = scmp.lt.s32.totalorder (!%p225_p2), %s649_s25, 7  ;;  %v655_v5 = vld [vmem:[%s845_s5] ss:$0 sm:$0xff] (!%p225_p2)  ;;  %v711_v25 = vld [vmem:[%s843_s3 + $0x8] sm:$0xff] (!%p225_p2)   ;;  %vm504_vm3 = vcmask (!%p225_p2), 1041408  }
   0x7   : > { %680 = vmatpush3.bf16.msra.mxu0 (!%p225_p2), %v709_v0  ;;  %681 = vmatprep.mubr.msk.bf16.mxu0 (!%p225_p2), %vm729_vm0, %v728_v1  ;;  %v710_v24 = vld [vmem:[%s843_s3] sm:$0xff] (!%p225_p2)   ;;  %vm500_vm4 = vcmask (!%p225_p2), 31744   ;;  %vm573_vm5 = vcmask (!%p225_p2), 7168  }
   0x8   : > { %689 = vmatprep.mubr.msk.bf16.mxu1 (!%p225_p2), %vm729_vm0, %v728_v1  ;;  %693 = vmatprep.subr.bf16.mxu0 (!%p225_p2), %v728_v1  ;;  %v658_v33 = vld [vmem:[%s845_s5 + $0x1] ss:$0 sm:$0xff] (!%p225_p2)  ;;  %v659_v37 = vld [vmem:[%s845_s5 + $0x2] ss:$0 sm:$0xff] (!%p225_p2)  ;;  %v660_v50 = vld [vmem:[%s845_s5 + $0x3] ss:$0 sm:$0xff] (!%p225_p2) }
   0x9   : > { %686 = vmatpush3.bf16.msra.mxu1 (!%p225_p2), %v710_v24  ;;  %v495_v45 = vld [vmem:[%s844_s4] sm:$0x3] (!%p225_p2) }
   0xa   : > { %687 = vmatprep.subr.bf16.mxu1 (!%p225_p2), %v728_v1  ;;  %v506_v46 = vsel (!%p225_p2), %vm504_vm3, %v495_v45, 0 }
   0xd   : > { %s848_s25 = smov (!%p260_p3, %s649_s25), 7  ;;  %688 = vmatpush3.bf16.msra.mxu1 %v711_v25 }
   0xe   : > { %s776_s26 = sshll.u32 %s848_s25, 3 }
   0xf   : > { %s263_s29 = scalar_lea.vmem %s840_s0, %s776_s26  ;;  %s269_s20 = scalar_lea.vmem %s841_s1, %s776_s26 }
  0x10   : > { %v287_v2 = vld [vmem:[%s263_s29] sm:$0xff]  ;;  %v288_v3 = vld [vmem:[%s263_s29 + $0x8] sm:$0xff]  ;;  %s275_s13 = scalar_lea.vmem %s846_s6, %s776_s26 }
  0x11   : > { %v289_v4 = vpack.c.bf16 %v288_v3, %v287_v2  ;;  %v290_v47 = vld [vmem:[%s269_s20] sm:$0xff]  ;;  %v291_v48 = vld [vmem:[%s269_s20 + $0x8] sm:$0xff] }
  0x12   : > { %v292_v49 = vpack.c.bf16 %v291_v48, %v290_v47 }
  0x13   : > { %682 = vmatmul.mubr.msk.bf16.vlgmr.msra.gmra.mrb[0].mxu0 %vm305_vm1, %v289_v4 }
  0x14   : > { %695 = vmatprep.mubr.msk.bf16.mxu0 %vm729_vm0, %v728_v1  ;;  %694 = vmatpush3.bf16.msra.mxu0 %v506_v46 }
  0x1b   : > { %696 = vmatmul.mubr.msk.bf16.vlgmr.msra.gmra.mrb[4].mxu0 %vm500_vm4, %v292_v49 }
  0xe6   : > { %v343_v6 = vpop.f32.mrb[0].mxu0 }
  0xe7   : > { %v344_v7 = vadd.f32 %v655_v5, %v343_v6  ;;  %v683_v8 = vpop.f32.mrb[1].mxu0 }
  0xe8   : > { %v346_v9 = vpop.f32.mrb[2].mxu0 }
  0xe9   : > { %v347_v10 = vadd.f32 %v655_v5, %v346_v9  ;;  %v684_v11 = vpop.f32.mrb[3].mxu0  ;;  %v351_v12 = vsel %vm350_vm2, %v344_v7, 0.0 }
  0xea   : > { %352 = vadd.xlane.f32.xlu0 %v351_v12 }
  0xeb   : > { %v354_v13 = vsel %vm350_vm2, %v347_v10, 0.0 }
  0xee   : > { %355 = vadd.xlane.f32.xlu0 %v354_v13  ;;  %v542_v5 = vpop.f32.mrb[4].mxu0 }
  0xef   : > { %v697_v6 = vpop.f32.mrb[5].mxu0 }
 0x177   : > { %v353_v14 = vpop.xlane.xlu0 %352 }
 0x178   : > { %v358_v15 = vmul.f32 0.03125, %v353_v14 }
 0x17a   : > { %v360_v16 = vsub.f32 %v344_v7, %v358_v15  ;;  %v545_v7 = vpop.f32.mrb[6].mxu0  ;;  %v666_v15 = vld [vmem:[%s845_s5 + $0x6] ss:$0 sm:$0xff] }
 0x17b   : > { %v356_v17 = vpop.xlane.xlu0 %355  ;;  %v698_v8 = vpop.f32.mrb[7].mxu0  ;;  %v546_v25 = vadd.f32 %v666_v15, %v545_v7 }
 0x17c   : > { %v359_v18 = vmul.f32 0.03125, %v356_v17  ;;  %v362_v19 = vmul.f32 %v360_v16, %v360_v16 }
 0x17e   : > { %v361_v20 = vsub.f32 %v347_v10, %v359_v18  ;;  %v364_v21 = vsel %vm350_vm2, %v362_v19, 0.0  ;;  %v664_v18 = vld [vmem:[%s845_s5 + $0x4] ss:$0 sm:$0xff] }
 0x17f   : > { %365 = vadd.xlane.f32.xlu1 %v364_v21  ;;  %v665_v21 = vld [vmem:[%s845_s5 + $0x5] ss:$0 sm:$0xff] }
 0x180   : > { %v363_v22 = vmul.f32 %v361_v20, %v361_v20 }
 0x182   : > { %v367_v23 = vsel %vm350_vm2, %v363_v22, 0.0 }
 0x183   : > { %368 = vadd.xlane.f32.xlu1 %v367_v23 }
 0x20c   : > { %v366_v26 = vpop.xlane.xlu1 %365 }
 0x20d   : > { %v370_v27 = vmul.f32 0.03125, %v366_v26 }
 0x20f   : > { %v372_v28 = vadd.f32 1e-05, %v370_v27 }
 0x210   : > { %v369_v29 = vpop.xlane.xlu1 %368 }
 0x211   : > { %712 = vrsqrt.f32 %v372_v28  ;;  %v371_v30 = vmul.f32 0.03125, %v369_v29 }
 0x213   : > { %v373_v31 = vadd.f32 1e-05, %v371_v30  ;;  %v550_v30 = vmax.f32 %v546_v25, 0.0 }
 0x215   : > { %714 = vrsqrt.f32 %v373_v31  ;;  %v668_v31 = vld [vmem:[%s845_s5 + $0x7] ss:$0 sm:$0xff] }
 0x21b   : > { %v713_v32 = vpop.eup %712 }
 0x21c   : > { %v376_v34 = vmul.f32 %v713_v32, %v360_v16  ;;  %v543_v16 = vadd.f32 %v666_v15, %v542_v5 }
 0x21e   : > { %v382_v35 = vmul.f32 %v658_v33, %v376_v34  ;;  %v549_v23 = vmax.f32 %v543_v16, 0.0 }
 0x21f   : > { %v715_v36 = vpop.eup %714 }
 0x220   : > { %v377_v38 = vmul.f32 %v715_v36, %v361_v20  ;;  %v388_v40 = vadd.f32 %v659_v37, %v382_v35 }
 0x222   : > { %v383_v39 = vmul.f32 %v658_v33, %v377_v38  ;;  %v390_v42 = vmax.f32 %v388_v40, 0.0 }
 0x224   : > { %v389_v41 = vadd.f32 %v659_v37, %v383_v39  ;;  %v669_v39 = vld [vmem:[%s845_s5 + $0x8] ss:$0 sm:$0xff] }
 0x226   : > { %v391_v43 = vmax.f32 %v389_v41, 0.0 }
 0x228   : > { %v392_v44 = vpack.c.bf16 %v391_v43, %v390_v42 }
 0x22a   : > { %690 = vmatmul.mubr.msk.bf16.vlgmr.msra.gmra.mrb[0].mxu1 %vm350_vm2, %v392_v44 }
 0x2fd   : > { %v450_v51 = vpop.f32.mrb[0].mxu1 }
 0x2fe   : > { %v451_v52 = vadd.f32 %v660_v50, %v450_v51  ;;  %v691_v53 = vpop.f32.mrb[1].mxu1 }
 0x2ff   : > { %v453_v54 = vpop.f32.mrb[2].mxu1 }
 0x300   : > { %v454_v55 = vadd.f32 %v660_v50, %v453_v54  ;;  %v692_v56 = vpop.f32.mrb[3].mxu1  ;;  %v457_v57 = vsel %vm350_vm2, %v451_v52, 0.0 }
 0x301   : > { %458 = vadd.xlane.f32.xlu0 %v457_v57 }
 0x302   : > { %v460_v58 = vsel %vm350_vm2, %v454_v55, 0.0 }
 0x303   : > { %461 = vadd.xlane.f32.xlu1 %v460_v58 }
 0x38e   : > { %v459_v59 = vpop.xlane.xlu0 %458 }
 0x38f   : > { %v463_v60 = vmul.f32 0.03125, %v459_v59 }
 0x390   : > { %v462_v61 = vpop.xlane.xlu1 %461 }
 0x391   : > { %v465_v62 = vsub.f32 %v451_v52, %v463_v60  ;;  %v464_v63 = vmul.f32 0.03125, %v462_v61 }
 0x393   : > { %v466_v0 = vsub.f32 %v454_v55, %v464_v63  ;;  %v467_v1 = vmul.f32 %v465_v62, %v465_v62 }
 0x395   : > { %v469_v2 = vsel %vm350_vm2, %v467_v1, 0.0  ;;  %v468_v3 = vmul.f32 %v466_v0, %v466_v0 }
 0x396   : > { %470 = vadd.xlane.f32.xlu0 %v469_v2 }
 0x397   : > { %v472_v4 = vsel %vm350_vm2, %v468_v3, 0.0 }
 0x398   : > { %473 = vadd.xlane.f32.xlu1 %v472_v4 }
 0x423   : > { %v471_v9 = vpop.xlane.xlu0 %470 }
 0x424   : > { %v475_v10 = vmul.f32 0.03125, %v471_v9 }
 0x425   : > { %v474_v11 = vpop.xlane.xlu1 %473 }
 0x426   : > { %v477_v12 = vadd.f32 1e-05, %v475_v10  ;;  %v476_v13 = vmul.f32 0.03125, %v474_v11 }
 0x428   : > { %716 = vrsqrt.f32 %v477_v12  ;;  %v478_v14 = vadd.f32 1e-05, %v476_v13 }
 0x42a   : > { %718 = vrsqrt.f32 %v478_v14 }
 0x432   : > { %v717_v17 = vpop.eup %716 }
 0x433   : > { %v481_v19 = vmul.f32 %v717_v17, %v465_v62 }
 0x434   : > { %v719_v20 = vpop.eup %718 }
 0x435   : > { %v487_v22 = vmul.f32 %v664_v18, %v481_v19  ;;  %v482_v24 = vmul.f32 %v719_v20, %v466_v0 }
 0x437   : > { %v493_v26 = vadd.f32 %v665_v21, %v487_v22  ;;  %v488_v27 = vmul.f32 %v664_v18, %v482_v24 }
 0x439   : > { %v551_v28 = vadd.f32 %v549_v23, %v493_v26  ;;  %v494_v29 = vadd.f32 %v665_v21, %v488_v27 }
 0x43b   : > { %v553_v32 = vmax.f32 %v551_v28, 0.0  ;;  %v552_v33 = vadd.f32 %v550_v30, %v494_v29 }
 0x43d   : > { %v554_v34 = vmax.f32 %v552_v33, 0.0  ;;  %v559_v35 = vmul.f32 %v668_v31, %v553_v32 }
 0x43f   : > { %v561_v36 = vsel %vm350_vm2, %v559_v35, 0.0  ;;  %v560_v37 = vmul.f32 %v668_v31, %v554_v34 }
 0x440   : > { %562 = vadd.xlane.f32.xlu0 %v561_v36 }
 0x441   : > { %v564_v38 = vsel %vm350_vm2, %v560_v37, 0.0 }
 0x442   : > { %565 = vadd.xlane.f32.xlu1 %v564_v38 }
 0x4cd   : > { %v563_v40 = vpop.xlane.xlu0 %562 }
 0x4ce   : > { %v571_v41 = vadd.f32 %v669_v39, %v563_v40 }
 0x4cf   : > { %v566_v42 = vpop.xlane.xlu1 %565 }
 0x4d0   : > { %574 = vst.msk [vmem:[%s275_s13] sm:$0xff] %vm573_vm5, %v571_v41  ;;  %v572_v43 = vadd.f32 %v669_v39, %v566_v42 }
 0x4d2   : > { %575 = vst.msk [vmem:[%s275_s13 + $0x8] sm:$0xff] %vm573_vm5, %v572_v43 }
 0x4d3 PF: > { %s16_s21 = sadd.s32 1, %s726_s21  }
 0x4d4   : > { %p13_p4 = scmp.ge.s32.totalorder %s16_s21, 6  }
 0x4d6   :  { %15 = sbr.rel (!%p13_p4) target bundleno = 1 (0x1), region = 77 }

</bundles_post_ra>
